<compile_context>
chip_gen: v5e
topology: v5e:2x2
jax: 0.10.0
libtpu: 0.0.40
codegen_flags: <defaults>
</compile_context>

<pallas_src>
import functools

import jax
import jax.numpy as jnp
from jax import lax
from jax.experimental import pallas as pl
from jax.experimental.pallas import tpu as pltpu


def _elu_plus_one(x):
    # elu(x) + 1 == where(x > 0, x + 1, exp(x))
    return jnp.where(x > 0, x + 1.0, jnp.exp(x))


def _attend_kernel(gate_ref, q_ref, k_ref, v_ref, cos_ref, sin_ref, o_ref,
                   mem_ref, norm_ref, *, causal, kv_chunk, resident_tables):
    bh = pl.program_id(0)
    s = pl.program_id(1)
    seg = q_ref.shape[1]
    d = q_ref.shape[2]
    half = d // 2
    n_chunks = seg // kv_chunk

    # Rotary tables for this segment (either VMEM-resident full tables, sliced here,
    # or a (seg, D) tile streamed by the pipeline).
    if resident_tables:
        row0 = s * seg
        cos = cos_ref[pl.ds(row0, seg), :]
        sin_signed = sin_ref[pl.ds(row0, seg), :]
    else:
        cos = cos_ref[...]
        sin_signed = sin_ref[...]

    def rope(x):
        # rotate_half(x) = concat(-x[:, half:], x[:, :half]); the sign is folded into
        # sin_signed on the host, so only the half-swap remains.
        swapped = jnp.concatenate([x[:, half:], x[:, :half]], axis=-1)
        return x * cos + swapped * sin_signed

    q = rope(q_ref[0].astype(jnp.float32))
    k = rope(k_ref[0].astype(jnp.float32))
    vb = v_ref[0].astype(jnp.bfloat16)

    # Reset the infini-attention memory at the first segment of each (b, h) program.
    @pl.when(s == 0)
    def _():
        mem_ref[...] = jnp.zeros_like(mem_ref)
        norm_ref[...] = jnp.zeros_like(norm_ref)

    # ---- SDPA (flash-style KV chunking, online softmax, bf16 matmuls, f32 accum). ----
    qb = (q * (d ** -0.5)).astype(jnp.bfloat16)   # fold 1/sqrt(D) into q (seg*D muls)
    kb = k.astype(jnp.bfloat16)

    m_i = jnp.full((seg, 1), -jnp.inf, jnp.float32)
    l_i = jnp.zeros((seg, 1), jnp.float32)
    acc = jnp.zeros((seg, d), jnp.float32)
    for c in range(n_chunks):                      # static (compile-time) chunk loop
        lo = c * kv_chunk
        kc = kb[lo:lo + kv_chunk, :]
        vc = vb[lo:lo + kv_chunk, :]
        # Contract the D axes of q and k directly (q @ k^T, no explicit transpose).
        logits = lax.dot_general(qb, kc, (((1,), (1,)), ((), ())),
                                 preferred_element_type=jnp.float32)
        if causal:
            row = lax.broadcasted_iota(jnp.int32, (seg, kv_chunk), 0)
            col = lax.broadcasted_iota(jnp.int32, (seg, kv_chunk), 1) + lo
            logits = jnp.where(col > row, -jnp.inf, logits)
        m_new = jnp.maximum(m_i, jnp.max(logits, axis=-1, keepdims=True))
        alpha = jnp.exp(m_i - m_new)
        p = jnp.exp(logits - m_new)
        l_i = alpha * l_i + jnp.sum(p, axis=-1, keepdims=True)
        acc = alpha * acc + jnp.dot(p.astype(jnp.bfloat16), vc,
                                    preferred_element_type=jnp.float32)
        m_i = m_new
    # Divide only the (seg, 1) denominator, then broadcast-multiply.
    attn = acc * (1.0 / l_i)

    g = gate_ref[bh]   # sigmoid(gate), precomputed on the host (SMEM scalar)

    @pl.when(s == 0)
    def _():
        # First segment: memory retrieval is identically zero.
        o_ref[0] = ((1.0 - g) * attn).astype(o_ref.dtype)

    @pl.when(s > 0)
    def _():
        # _retrieve_from_memory — uses the memory state BEFORE this segment's update.
        qe = _elu_plus_one(q)
        num = jnp.dot(qe.astype(jnp.bfloat16), mem_ref[...].astype(jnp.bfloat16),
                      preferred_element_type=jnp.float32)
        den = jnp.sum(qe * norm_ref[...], axis=-1, keepdims=True)
        mem_out = num * (1.0 / (den + 1e-6))
        o_ref[0] = (attn + g * (mem_out - attn)).astype(o_ref.dtype)

    # ---- _update_memory (sequenced after the retrieval above via ref effects). ----
    ke = _elu_plus_one(k)
    mem_ref[...] = mem_ref[...] + lax.dot_general(
        ke.astype(jnp.bfloat16), vb, (((0,), (0,)), ((), ())),   # ke^T @ v, no transpose
        preferred_element_type=jnp.float32)
    norm_ref[...] = norm_ref[...] + jnp.sum(ke, axis=0, keepdims=True)


def rotary_tables(seq_len, dim, theta=10000.0, scale_base=8192):
    inv_freq = 1.0 / (theta ** (jnp.arange(0, dim, 2, dtype=jnp.float32) / dim))
    t = jnp.arange(seq_len, dtype=jnp.float32) * (scale_base / seq_len)
    freqs = jnp.einsum("i,j->ij", t, inv_freq)
    emb = jnp.concatenate([freqs, freqs], axis=-1)          # (seq_len, dim)
    return jnp.cos(emb), jnp.sin(emb)


def attend_forward(q, k, v, gate, *, segment_len, causal=False,
                   theta=10000.0, context_len=8192, kv_chunk=None):
    B, H, N, D = q.shape
    assert N % segment_len == 0
    assert segment_len % 8 == 0 and D % 2 == 0
    n_seg = N // segment_len
    if kv_chunk is None:
        kv_chunk = min(segment_len, 512)
    assert segment_len % kv_chunk == 0
    BH = B * H

    cos, sin = rotary_tables(N, D, theta=theta, scale_base=context_len)
    # Fold the rotate_half sign (-1 on the first half of the lanes) into sin.
    sign = jnp.where(jnp.arange(D) < D // 2, -1.0, 1.0).astype(jnp.float32)
    sin_signed = sin * sign[None, :]

    qf = q.reshape(BH, N, D)
    kf = k.reshape(BH, N, D)
    vf = v.reshape(BH, N, D)
    # sigmoid(gate) precomputed on the host; one scalar per (b, h) grid program.
    g = jax.nn.sigmoid(gate.astype(jnp.float32).reshape(1, H))
    gate_flat = jnp.broadcast_to(g, (B, H)).reshape(BH)

    # Keep the rotary tables resident in VMEM when small (no re-DMA across the bh axis);
    # otherwise stream a (segment_len, D) tile per grid step.
    resident_tables = 2 * N * D * 4 <= 8 * 1024 * 1024
    if resident_tables:
        table_spec = pl.BlockSpec((N, D), lambda bh, s: (0, 0))
    else:
        table_spec = pl.BlockSpec((segment_len, D), lambda bh, s: (s, 0))

    grid_spec = pltpu.PrefetchScalarGridSpec(
        num_scalar_prefetch=0,
        grid=(BH, n_seg),
        in_specs=[
            pl.BlockSpec(memory_space=pltpu.MemorySpace.SMEM),            # sigmoid(gate) (BH,)
            pl.BlockSpec((1, segment_len, D), lambda bh, s: (bh, s, 0)),  # q
            pl.BlockSpec((1, segment_len, D), lambda bh, s: (bh, s, 0)),  # k
            pl.BlockSpec((1, segment_len, D), lambda bh, s: (bh, s, 0)),  # v
            table_spec,                                                   # cos
            table_spec,                                                   # sin * sign
        ],
        out_specs=pl.BlockSpec((1, segment_len, D), lambda bh, s: (bh, s, 0)),
        scratch_shapes=[
            pltpu.VMEM((D, D), jnp.float32),   # compressive memory M
            pltpu.VMEM((1, D), jnp.float32),   # norm term z
        ],
    )

    out = pl.pallas_call(
        functools.partial(_attend_kernel, causal=causal, kv_chunk=kv_chunk,
                          resident_tables=resident_tables),
        out_shape=jax.ShapeDtypeStruct((BH, N, D), q.dtype),
        grid_spec=grid_spec,
        compiler_params=pltpu.CompilerParams(
            dimension_semantics=("parallel", "arbitrary"),
            vmem_limit_bytes=32 * 1024 * 1024),
    )(gate_flat, qf, kf, vf, cos, sin_signed)
    return out.reshape(B, H, N, D)


def attend_reference(q, k, v, gate, *, segment_len, causal=False,
                     theta=10000.0, context_len=8192):
    """Pure-JAX reference mirroring the PyTorch module (same bf16 sdpa casts)."""
    B, H, N, D = q.shape
    cos, sin = rotary_tables(N, D, theta=theta, scale_base=context_len)
    cos, sin = cos[None, None], sin[None, None]

    def rot_half(x):
        x1, x2 = x[..., :D // 2], x[..., D // 2:]
        return jnp.concatenate([-x2, x1], axis=-1)

    q = q * cos + rot_half(q) * sin
    k = k * cos + rot_half(k) * sin

    n_seg = N // segment_len
    g = jax.nn.sigmoid(gate.reshape(1, H, 1, 1)).astype(jnp.float32)
    mem = jnp.zeros((B, H, D, D), jnp.float32)
    norm = jnp.zeros((B, H, 1, D), jnp.float32)
    outs = []
    for i in range(n_seg):
        sl = slice(i * segment_len, (i + 1) * segment_len)
        qs, ks, vs = q[:, :, sl], k[:, :, sl], v[:, :, sl]
        if i == 0:
            mem_out = jnp.zeros_like(qs, dtype=jnp.float32)
        else:
            qe = jax.nn.elu(qs.astype(jnp.float32)) + 1.0
            num = jnp.einsum("bhnd,bhde->bhne", qe, mem)
            den = jnp.einsum("bhnd,bhd->bhn", qe, norm[:, :, 0])[..., None]
            mem_out = num / (den + 1e-6)
        ke = jax.nn.elu(ks.astype(jnp.float32)) + 1.0
        mem = mem + jnp.einsum("bhnd,bhne->bhde", ke, vs.astype(jnp.float32))
        norm = norm + jnp.sum(ke, axis=-2, keepdims=True)

        qb, kb, vb = (t.astype(jnp.bfloat16) for t in (qs, ks, vs))
        logits = jnp.einsum("bhnd,bhmd->bhnm", qb, kb,
                            preferred_element_type=jnp.float32) * (D ** -0.5)
        if causal:
            m = jnp.triu(jnp.ones((segment_len, segment_len), bool), 1)
            logits = jnp.where(m, -jnp.inf, logits)
        probs = jax.nn.softmax(logits, axis=-1)
        attn = jnp.einsum("bhnm,bhmd->bhnd", probs.astype(jnp.bfloat16), vb,
                          preferred_element_type=jnp.float32)
        outs.append(g * mem_out + (1.0 - g) * attn)
    return jnp.concatenate(outs, axis=-2).astype(q.dtype)


if __name__ == "__main__":
    B, H, N, D = 2, 2, 32, 128     # batch, heads, seq, dim_head
    SEGMENT_LEN = 16               # -> 2 infini segments
    KV_CHUNK = 8                   # -> 2 KV chunks / segment (exercises online softmax)
    CONTEXT_LEN = 64               # rotary scale_base (context_len arg of Attend)

    key = jax.random.PRNGKey(0)
    kq, kk, kv = jax.random.split(key, 3)
    q = jax.random.normal(kq, (B, H, N, D), jnp.float32)
    k = jax.random.normal(kk, (B, H, N, D), jnp.float32)
    v = jax.random.normal(kv, (B, H, N, D), jnp.float32)
    # nn.Parameter(torch.full((1, heads, 1, 1), 0.0)) — deterministic init.
    gate = jnp.zeros((1, H, 1, 1), jnp.float32)

    for causal in (False, True):
        out = jax.block_until_ready(
            attend_forward(q, k, v, gate, segment_len=SEGMENT_LEN,
                           causal=causal, context_len=CONTEXT_LEN,
                           kv_chunk=KV_CHUNK))
        ref = attend_reference(q, k, v, gate, segment_len=SEGMENT_LEN,
                               causal=causal, context_len=CONTEXT_LEN)
        assert out.shape == (B, H, N, D)
        assert bool(jnp.all(jnp.isfinite(out)))
        max_err = float(jnp.max(jnp.abs(out - ref)))
        assert max_err < 2e-2, f"causal={causal}: max abs err = {max_err}"
    print("KERNEL_OK")
</pallas_src>

<mosaic_0001>
module attributes {stable_mosaic.version = 11 : i64} {
  func.func @_attend_kernel(%arg0: i32, %arg1: i32, %arg2: memref<4xf32, #tpu.memory_space<smem>>, %arg3: memref<1x16x128xf32, #tpu.memory_space<vmem>>, %arg4: memref<1x16x128xf32, #tpu.memory_space<vmem>>, %arg5: memref<1x16x128xf32, #tpu.memory_space<vmem>>, %arg6: memref<32x128xf32, #tpu.memory_space<vmem>>, %arg7: memref<32x128xf32, #tpu.memory_space<vmem>>, %arg8: memref<1x16x128xf32, #tpu.memory_space<vmem>>, %arg9: memref<128x128xf32, #tpu.memory_space<vmem>>, %arg10: memref<1x128xf32, #tpu.memory_space<vmem>>) attributes {dimension_semantics = [#tpu.dimension_semantics<parallel>, #tpu.dimension_semantics<arbitrary>], iteration_bounds = array<i64: 4, 2>, scalar_prefetch = 0 : i64, scratch_operands = 2 : i64, tpu.core_type = #tpu.core_type<tc>, window_params = [{transform_indices = @transform_0, window_bounds = array<i64: 4>}, {transform_indices = @transform_1, window_bounds = array<i64: 1, 16, 128>}, {transform_indices = @transform_2, window_bounds = array<i64: 1, 16, 128>}, {transform_indices = @transform_3, window_bounds = array<i64: 1, 16, 128>}, {pipeline_mode = #tpu.pipeline_mode<synchronous>, transform_indices = @transform_4, window_bounds = array<i64: 32, 128>}, {pipeline_mode = #tpu.pipeline_mode<synchronous>, transform_indices = @transform_5, window_bounds = array<i64: 32, 128>}, {transform_indices = @transform_6, window_bounds = array<i64: 1, 16, 128>}]} {
    %c16_i32 = arith.constant 16 : i32
    %0 = arith.muli %arg1, %c16_i32 : i32
    %1 = arith.index_cast %0 : i32 to index
    %c0 = arith.constant 0 : index
    %2 = vector.load %arg6[%1, %c0] : memref<32x128xf32, #tpu.memory_space<vmem>>, vector<16x128xf32>
    %3 = arith.index_cast %0 : i32 to index
    %c0_0 = arith.constant 0 : index
    %4 = vector.load %arg7[%3, %c0_0] : memref<32x128xf32, #tpu.memory_space<vmem>>, vector<16x128xf32>
    %c0_1 = arith.constant 0 : index
    %c0_2 = arith.constant 0 : index
    %c0_3 = arith.constant 0 : index
    %5 = vector.load %arg3[%c0_1, %c0_2, %c0_3] : memref<1x16x128xf32, #tpu.memory_space<vmem>>, vector<1x16x128xf32>
    %6 = vector.shape_cast %5 : vector<1x16x128xf32> to vector<16x128xf32>
    %7 = vector.extract_strided_slice %6 {offsets = [0, 64], sizes = [16, 64], strides = [1, 1]} : vector<16x128xf32> to vector<16x64xf32>
    %8 = vector.extract_strided_slice %6 {offsets = [0, 0], sizes = [16, 64], strides = [1, 1]} : vector<16x128xf32> to vector<16x64xf32>
    %9 = tpu.concatenate %7, %8 in 1 : vector<16x64xf32>, vector<16x64xf32> -> vector<16x128xf32>
    %10 = arith.mulf %6, %2 : vector<16x128xf32>
    %11 = arith.mulf %9, %4 : vector<16x128xf32>
    %12 = arith.addf %10, %11 : vector<16x128xf32>
    %c0_4 = arith.constant 0 : index
    %c0_5 = arith.constant 0 : index
    %c0_6 = arith.constant 0 : index
    %13 = vector.load %arg4[%c0_4, %c0_5, %c0_6] : memref<1x16x128xf32, #tpu.memory_space<vmem>>, vector<1x16x128xf32>
    %14 = vector.shape_cast %13 : vector<1x16x128xf32> to vector<16x128xf32>
    %15 = vector.extract_strided_slice %14 {offsets = [0, 64], sizes = [16, 64], strides = [1, 1]} : vector<16x128xf32> to vector<16x64xf32>
    %16 = vector.extract_strided_slice %14 {offsets = [0, 0], sizes = [16, 64], strides = [1, 1]} : vector<16x128xf32> to vector<16x64xf32>
    %17 = tpu.concatenate %15, %16 in 1 : vector<16x64xf32>, vector<16x64xf32> -> vector<16x128xf32>
    %18 = arith.mulf %14, %2 : vector<16x128xf32>
    %19 = arith.mulf %17, %4 : vector<16x128xf32>
    %20 = arith.addf %18, %19 : vector<16x128xf32>
    %c0_7 = arith.constant 0 : index
    %c0_8 = arith.constant 0 : index
    %c0_9 = arith.constant 0 : index
    %21 = vector.load %arg5[%c0_7, %c0_8, %c0_9] : memref<1x16x128xf32, #tpu.memory_space<vmem>>, vector<1x16x128xf32>
    %22 = vector.shape_cast %21 : vector<1x16x128xf32> to vector<16x128xf32>
    %23 = arith.truncf %22 : vector<16x128xf32> to vector<16x128xbf16>
    %c0_i32 = arith.constant 0 : i32
    %24 = arith.cmpi eq, %arg1, %c0_i32 : i32
    %25 = arith.extui %24 : i1 to i32
    %c0_i32_10 = arith.constant 0 : i32
    %26 = arith.cmpi ne, %25, %c0_i32_10 : i32
    scf.if %26 {
      %cst_39 = arith.constant 0.000000e+00 : f32
      %102 = vector.broadcast %cst_39 : f32 to vector<128x128xf32>
      %c0_40 = arith.constant 0 : index
      %c0_41 = arith.constant 0 : index
      %103 = vector.load %arg9[%c0_40, %c0_41] : memref<128x128xf32, #tpu.memory_space<vmem>>, vector<128x128xf32>
      tpu.vector_store %arg9[%c0_40, %c0_41], %102 {strides = array<i32>} : memref<128x128xf32, #tpu.memory_space<vmem>>, vector<128x128xf32>,
      %cst_42 = arith.constant 0.000000e+00 : f32
      %104 = vector.broadcast %cst_42 : f32 to vector<1x128xf32>
      %c0_43 = arith.constant 0 : index
      %c0_44 = arith.constant 0 : index
      %105 = vector.load %arg10[%c0_43, %c0_44] : memref<1x128xf32, #tpu.memory_space<vmem>>, vector<1x128xf32>
      tpu.vector_store %arg10[%c0_43, %c0_44], %104 {strides = array<i32>} : memref<1x128xf32, #tpu.memory_space<vmem>>, vector<1x128xf32>,
    } else {
    }
    %cst = arith.constant 0.0883883461 : f32
    %27 = vector.broadcast %cst : f32 to vector<16x128xf32>
    %28 = arith.mulf %12, %27 : vector<16x128xf32>
    %29 = arith.truncf %28 : vector<16x128xf32> to vector<16x128xbf16>
    %30 = arith.truncf %20 : vector<16x128xf32> to vector<16x128xbf16>
    %cst_11 = arith.constant 0xFF800000 : f32
    %31 = vector.broadcast %cst_11 : f32 to vector<16x1xf32>
    %cst_12 = arith.constant 0.000000e+00 : f32
    %32 = vector.broadcast %cst_12 : f32 to vector<16x1xf32>
    %cst_13 = arith.constant 0.000000e+00 : f32
    %33 = vector.broadcast %cst_13 : f32 to vector<16x128xf32>
    %34 = vector.extract_strided_slice %30 {offsets = [0, 0], sizes = [8, 128], strides = [1, 1]} : vector<16x128xbf16> to vector<8x128xbf16>
    %35 = vector.extract_strided_slice %23 {offsets = [0, 0], sizes = [8, 128], strides = [1, 1]} : vector<16x128xbf16> to vector<8x128xbf16>
    %cst_14 = arith.constant dense<0.000000e+00> : vector<16x8xf32>
    %36 = tpu.matmul %29, %34, %cst_14 {dimension_numbers = #tpu.dot_dimension_numbers<[1], [1], [0], [0], [0, 0, 1, 0], [], []>} : vector<16x128xbf16>, vector<8x128xbf16>, vector<16x8xf32> -> vector<16x8xf32>
    %cst_15 = arith.constant dense<0xFF800000> : vector<16xf32>
    %37 = vector.multi_reduction <maximumf>, %36, %cst_15 [1] : vector<16x8xf32> to vector<16xf32>
    %38 = vector.shape_cast %37 : vector<16xf32> to vector<16x1xf32>
    %39 = arith.maximumf %31, %38 : vector<16x1xf32>
    %40 = arith.subf %31, %39 : vector<16x1xf32>
    %41 = math.exp %40 : vector<16x1xf32>
    %42 = vector.broadcast %39 : vector<16x1xf32> to vector<16x8xf32>
    %43 = arith.subf %36, %42 : vector<16x8xf32>
    %44 = math.exp %43 : vector<16x8xf32>
    %45 = arith.mulf %41, %32 : vector<16x1xf32>
    %cst_16 = arith.constant dense<0.000000e+00> : vector<16xf32>
    %46 = vector.multi_reduction <add>, %44, %cst_16 [1] : vector<16x8xf32> to vector<16xf32>
    %47 = vector.shape_cast %46 : vector<16xf32> to vector<16x1xf32>
    %48 = arith.addf %45, %47 : vector<16x1xf32>
    %49 = vector.broadcast %41 : vector<16x1xf32> to vector<16x128xf32>
    %50 = arith.mulf %49, %33 : vector<16x128xf32>
    %51 = arith.truncf %44 : vector<16x8xf32> to vector<16x8xbf16>
    %cst_17 = arith.constant dense<0.000000e+00> : vector<16x128xf32>
    %52 = tpu.matmul %51, %35, %cst_17 {dimension_numbers = #tpu.dot_dimension_numbers<[1], [0], [0], [1], [0, 0, 1, 1], [], []>} : vector<16x8xbf16>, vector<8x128xbf16>, vector<16x128xf32> -> vector<16x128xf32>
    %53 = arith.addf %50, %52 : vector<16x128xf32>
    %54 = vector.extract_strided_slice %30 {offsets = [8, 0], sizes = [8, 128], strides = [1, 1]} : vector<16x128xbf16> to vector<8x128xbf16>
    %55 = vector.extract_strided_slice %23 {offsets = [8, 0], sizes = [8, 128], strides = [1, 1]} : vector<16x128xbf16> to vector<8x128xbf16>
    %cst_18 = arith.constant dense<0.000000e+00> : vector<16x8xf32>
    %56 = tpu.matmul %29, %54, %cst_18 {dimension_numbers = #tpu.dot_dimension_numbers<[1], [1], [0], [0], [0, 0, 1, 0], [], []>} : vector<16x128xbf16>, vector<8x128xbf16>, vector<16x8xf32> -> vector<16x8xf32>
    %cst_19 = arith.constant dense<0xFF800000> : vector<16xf32>
    %57 = vector.multi_reduction <maximumf>, %56, %cst_19 [1] : vector<16x8xf32> to vector<16xf32>
    %58 = vector.shape_cast %57 : vector<16xf32> to vector<16x1xf32>
    %59 = arith.maximumf %39, %58 : vector<16x1xf32>
    %60 = arith.subf %39, %59 : vector<16x1xf32>
    %61 = math.exp %60 : vector<16x1xf32>
    %62 = vector.broadcast %59 : vector<16x1xf32> to vector<16x8xf32>
    %63 = arith.subf %56, %62 : vector<16x8xf32>
    %64 = math.exp %63 : vector<16x8xf32>
    %65 = arith.mulf %61, %48 : vector<16x1xf32>
    %cst_20 = arith.constant dense<0.000000e+00> : vector<16xf32>
    %66 = vector.multi_reduction <add>, %64, %cst_20 [1] : vector<16x8xf32> to vector<16xf32>
    %67 = vector.shape_cast %66 : vector<16xf32> to vector<16x1xf32>
    %68 = arith.addf %65, %67 : vector<16x1xf32>
    %69 = vector.broadcast %61 : vector<16x1xf32> to vector<16x128xf32>
    %70 = arith.mulf %69, %53 : vector<16x128xf32>
    %71 = arith.truncf %64 : vector<16x8xf32> to vector<16x8xbf16>
    %cst_21 = arith.constant dense<0.000000e+00> : vector<16x128xf32>
    %72 = tpu.matmul %71, %55, %cst_21 {dimension_numbers = #tpu.dot_dimension_numbers<[1], [0], [0], [1], [0, 0, 1, 1], [], []>} : vector<16x8xbf16>, vector<8x128xbf16>, vector<16x128xf32> -> vector<16x128xf32>
    %73 = arith.addf %70, %72 : vector<16x128xf32>
    %cst_22 = arith.constant 1.000000e+00 : f32
    %74 = vector.broadcast %cst_22 : f32 to vector<16x1xf32>
    %75 = arith.divf %74, %68 : vector<16x1xf32>
    %76 = vector.broadcast %75 : vector<16x1xf32> to vector<16x128xf32>
    %77 = arith.mulf %73, %76 : vector<16x128xf32>
    %78 = arith.index_cast %arg0 : i32 to index
    %79 = memref.load %arg2[%78] : memref<4xf32, #tpu.memory_space<smem>>
    %c0_i32_23 = arith.constant 0 : i32
    %80 = arith.cmpi eq, %arg1, %c0_i32_23 : i32
    %81 = arith.extui %80 : i1 to i32
    %c0_i32_24 = arith.constant 0 : i32
    %82 = arith.cmpi ne, %81, %c0_i32_24 : i32
    scf.if %82 {
      %cst_39 = arith.constant 1.000000e+00 : f32
      %102 = arith.subf %cst_39, %79 : f32
      %103 = vector.broadcast %102 : f32 to vector<16x128xf32>
      %104 = arith.mulf %103, %77 : vector<16x128xf32>
      %c0_40 = arith.constant 0 : index
      %c0_41 = arith.constant 0 : index
      %c0_42 = arith.constant 0 : index
      %105 = vector.load %arg8[%c0_40, %c0_41, %c0_42] : memref<1x16x128xf32, #tpu.memory_space<vmem>>, vector<1x16x128xf32>
      %106 = vector.shape_cast %105 : vector<1x16x128xf32> to vector<16x128xf32>
      %107 = vector.shape_cast %104 : vector<16x128xf32> to vector<1x16x128xf32>
      tpu.vector_store %arg8[%c0_40, %c0_41, %c0_42], %107 {strides = array<i32>} : memref<1x16x128xf32, #tpu.memory_space<vmem>>, vector<1x16x128xf32>,
    } else {
    }
    %c0_i32_25 = arith.constant 0 : i32
    %83 = arith.cmpi sgt, %arg1, %c0_i32_25 : i32
    %84 = arith.extui %83 : i1 to i32
    %c0_i32_26 = arith.constant 0 : i32
    %85 = arith.cmpi ne, %84, %c0_i32_26 : i32
    scf.if %85 {
      %cst_39 = arith.constant 0.000000e+00 : f32
      %102 = vector.broadcast %cst_39 : f32 to vector<16x128xf32>
      %103 = arith.cmpf ogt, %12, %102 : vector<16x128xf32>
      %cst_40 = arith.constant 1.000000e+00 : f32
      %104 = vector.broadcast %cst_40 : f32 to vector<16x128xf32>
      %105 = arith.addf %12, %104 : vector<16x128xf32>
      %106 = math.exp %12 : vector<16x128xf32>
      %107 = arith.select %103, %105, %106 : vector<16x128xi1>, vector<16x128xf32>
      %108 = arith.truncf %107 : vector<16x128xf32> to vector<16x128xbf16>
      %c0_41 = arith.constant 0 : index
      %c0_42 = arith.constant 0 : index
      %109 = vector.load %arg9[%c0_41, %c0_42] : memref<128x128xf32, #tpu.memory_space<vmem>>, vector<128x128xf32>
      %110 = arith.truncf %109 : vector<128x128xf32> to vector<128x128xbf16>
      %cst_43 = arith.constant dense<0.000000e+00> : vector<16x128xf32>
      %111 = tpu.matmul %108, %110, %cst_43 {dimension_numbers = #tpu.dot_dimension_numbers<[1], [0], [0], [1], [0, 0, 1, 1], [], []>} : vector<16x128xbf16>, vector<128x128xbf16>, vector<16x128xf32> -> vector<16x128xf32>
      %c0_44 = arith.constant 0 : index
      %c0_45 = arith.constant 0 : index
      %112 = vector.load %arg10[%c0_44, %c0_45] : memref<1x128xf32, #tpu.memory_space<vmem>>, vector<1x128xf32>
      %113 = vector.broadcast %112 : vector<1x128xf32> to vector<16x128xf32>
      %114 = arith.mulf %107, %113 : vector<16x128xf32>
      %cst_46 = arith.constant dense<0.000000e+00> : vector<16xf32>
      %115 = vector.multi_reduction <add>, %114, %cst_46 [1] : vector<16x128xf32> to vector<16xf32>
      %116 = vector.shape_cast %115 : vector<16xf32> to vector<16x1xf32>
      %cst_47 = arith.constant 9.99999997E-7 : f32
      %117 = vector.broadcast %cst_47 : f32 to vector<16x1xf32>
      %118 = arith.addf %116, %117 : vector<16x1xf32>
      %cst_48 = arith.constant 1.000000e+00 : f32
      %119 = vector.broadcast %cst_48 : f32 to vector<16x1xf32>
      %120 = arith.divf %119, %118 : vector<16x1xf32>
      %121 = vector.broadcast %120 : vector<16x1xf32> to vector<16x128xf32>
      %122 = arith.mulf %111, %121 : vector<16x128xf32>
      %123 = arith.subf %122, %77 : vector<16x128xf32>
      %124 = vector.broadcast %79 : f32 to vector<16x128xf32>
      %125 = arith.mulf %124, %123 : vector<16x128xf32>
      %126 = arith.addf %77, %125 : vector<16x128xf32>
      %c0_49 = arith.constant 0 : index
      %c0_50 = arith.constant 0 : index
      %c0_51 = arith.constant 0 : index
      %127 = vector.load %arg8[%c0_49, %c0_50, %c0_51] : memref<1x16x128xf32, #tpu.memory_space<vmem>>, vector<1x16x128xf32>
      %128 = vector.shape_cast %127 : vector<1x16x128xf32> to vector<16x128xf32>
      %129 = vector.shape_cast %126 : vector<16x128xf32> to vector<1x16x128xf32>
      tpu.vector_store %arg8[%c0_49, %c0_50, %c0_51], %129 {strides = array<i32>} : memref<1x16x128xf32, #tpu.memory_space<vmem>>, vector<1x16x128xf32>,
    } else {
    }
    %cst_27 = arith.constant 0.000000e+00 : f32
    %86 = vector.broadcast %cst_27 : f32 to vector<16x128xf32>
    %87 = arith.cmpf ogt, %20, %86 : vector<16x128xf32>
    %cst_28 = arith.constant 1.000000e+00 : f32
    %88 = vector.broadcast %cst_28 : f32 to vector<16x128xf32>
    %89 = arith.addf %20, %88 : vector<16x128xf32>
    %90 = math.exp %20 : vector<16x128xf32>
    %91 = arith.select %87, %89, %90 : vector<16x128xi1>, vector<16x128xf32>
    %c0_29 = arith.constant 0 : index
    %c0_30 = arith.constant 0 : index
    %92 = vector.load %arg9[%c0_29, %c0_30] : memref<128x128xf32, #tpu.memory_space<vmem>>, vector<128x128xf32>
    %93 = arith.truncf %91 : vector<16x128xf32> to vector<16x128xbf16>
    %cst_31 = arith.constant dense<0.000000e+00> : vector<128x128xf32>
    %94 = tpu.matmul %93, %23, %cst_31 {dimension_numbers = #tpu.dot_dimension_numbers<[0], [0], [1], [1], [0, 1, 1, 1], [], []>} : vector<16x128xbf16>, vector<16x128xbf16>, vector<128x128xf32> -> vector<128x128xf32>
    %95 = arith.addf %92, %94 : vector<128x128xf32>
    %c0_32 = arith.constant 0 : index
    %c0_33 = arith.constant 0 : index
    %96 = vector.load %arg9[%c0_32, %c0_33] : memref<128x128xf32, #tpu.memory_space<vmem>>, vector<128x128xf32>
    tpu.vector_store %arg9[%c0_32, %c0_33], %95 {strides = array<i32>} : memref<128x128xf32, #tpu.memory_space<vmem>>, vector<128x128xf32>,
    %c0_34 = arith.constant 0 : index
    %c0_35 = arith.constant 0 : index
    %97 = vector.load %arg10[%c0_34, %c0_35] : memref<1x128xf32, #tpu.memory_space<vmem>>, vector<1x128xf32>
    %cst_36 = arith.constant dense<0.000000e+00> : vector<128xf32>
    %98 = vector.multi_reduction <add>, %91, %cst_36 [0] : vector<16x128xf32> to vector<128xf32>
    %99 = vector.shape_cast %98 : vector<128xf32> to vector<1x128xf32>
    %100 = arith.addf %97, %99 : vector<1x128xf32>
    %c0_37 = arith.constant 0 : index
    %c0_38 = arith.constant 0 : index
    %101 = vector.load %arg10[%c0_37, %c0_38] : memref<1x128xf32, #tpu.memory_space<vmem>>, vector<1x128xf32>
    tpu.vector_store %arg10[%c0_37, %c0_38], %100 {strides = array<i32>} : memref<1x128xf32, #tpu.memory_space<vmem>>, vector<1x128xf32>,
    return
  }
  func.func @transform_0(%arg0: i32, %arg1: i32) -> i32 {
    %c0_i32 = arith.constant 0 : i32
    %c0_i32_0 = arith.constant 0 : i32
    return %c0_i32 : i32
  }
  func.func @transform_1(%arg0: i32, %arg1: i32) -> (i32, i32, i32) {
    %c0_i32 = arith.constant 0 : i32
    %c0_i32_0 = arith.constant 0 : i32
    return %arg0, %arg1, %c0_i32 : i32, i32, i32
  }
  func.func @transform_2(%arg0: i32, %arg1: i32) -> (i32, i32, i32) {
    %c0_i32 = arith.constant 0 : i32
    %c0_i32_0 = arith.constant 0 : i32
    return %arg0, %arg1, %c0_i32 : i32, i32, i32
  }
  func.func @transform_3(%arg0: i32, %arg1: i32) -> (i32, i32, i32) {
    %c0_i32 = arith.constant 0 : i32
    %c0_i32_0 = arith.constant 0 : i32
    return %arg0, %arg1, %c0_i32 : i32, i32, i32
  }
  func.func @transform_4(%arg0: i32, %arg1: i32) -> (i32, i32) {
    %c0_i32 = arith.constant 0 : i32
    %c0_i32_0 = arith.constant 0 : i32
    %c0_i32_1 = arith.constant 0 : i32
    return %c0_i32, %c0_i32_0 : i32, i32
  }
  func.func @transform_5(%arg0: i32, %arg1: i32) -> (i32, i32) {
    %c0_i32 = arith.constant 0 : i32
    %c0_i32_0 = arith.constant 0 : i32
    %c0_i32_1 = arith.constant 0 : i32
    return %c0_i32, %c0_i32_0 : i32, i32
  }
  func.func @transform_6(%arg0: i32, %arg1: i32) -> (i32, i32, i32) {
    %c0_i32 = arith.constant 0 : i32
    %c0_i32_0 = arith.constant 0 : i32
    return %arg0, %arg1, %c0_i32 : i32, i32, i32
  }
}

</mosaic_0001>

<bundles_post_ra>
// kernel: tpu_custom_call.1
= control target key start
LH: loop header
LB: loop body
LE: loop exit
PB: predicated region body
PF: predicated region fallthrough
CT: control target
= control target key end

     0   :  { %s1994_s0 = inlined_call_operand.hbm [shape: f32[4], index: 0, kind: input, shape index: {}]   ;;  %s1995_s1 = inlined_call_operand.hbm [shape: f32[4,32,128], index: 1, kind: input, shape index: {}]   ;;  %s1996_s2 = inlined_call_operand.hbm [shape: f32[4,32,128], index: 2, kind: input, shape index: {}]   ;;  %s1997_s3 = inlined_call_operand.hbm [shape: f32[4,32,128], index: 3, kind: input, shape index: {}]   ;;  %s1998_s4 = inlined_call_operand.hbm [shape: f32[32,128], index: 4, kind: input, shape index: {}]   ;;  %s1999_s5 = inlined_call_operand.hbm [shape: f32[32,128], index: 5, kind: input, shape index: {}]   ;;  %s2000_s6 = inlined_call_operand.hbm [shape: f32[4,32,128], index: 6, kind: output, shape index: {}]  }
   0x1   :  { %2013 = sst [smem:[#allocation28_spill]] %s1994_s0 }
   0x2   :  { %2014 = sst [smem:[#allocation29_spill]] %s1996_s2 }
   0x3   :  { %2015 = sst [smem:[#allocation30_spill]] %s1998_s4 }
   0x4   :  { %2016 = sst [smem:[#allocation31_spill]] %s2000_s6 }
   0x5   :  { %11 = vsyncpa [#allocation7], 0 }
   0x6   :  { %12 = vsyncpa [#allocation5], 0 }
   0x7   :  { %14 = vsyncpa [#allocation5 + $0x1], 0 }
   0x8   :  { %15 = vsyncpa [#allocation10], 0 }
   0x9   :  { %17 = vsyncpa [#allocation10 + $0x1], 0 }
   0xa   :  { %18 = vsyncpa [#allocation13], 0 }
   0xb   :  { %19 = vsyncpa [#allocation6], 0 }
   0xc   :  { %21 = vsyncpa [#allocation6 + $0x1], 0  ;;  %s1671_s21 = smov 0   ;;  %s1673_s22 = smov 0  }
   0xd   :  { %s1675_s23 = smov 0   ;;  %s1677_s24 = smov 0  }
   0xe   :  { %s1679_s25 = smov 0   ;;  %s1681_s26 = smov 0  }
   0xf   :  { %s1683_s27 = smov 0   ;;  %s1685_s28 = smov 0  }
  0x10 LB: > { %2017 = sst [smem:[#allocation21_spill]] %s1597_s21  ;;  %s1712_s29 = sadd.s32 4294967295, %s1625_s28   ;;  %s1625_s28 = sphi %s1685_s28, %s27_s28   ;;  %s1621_s27 = sphi %s1683_s27, %s2044_s27   ;;  %s1617_s26 = sphi %s1681_s26, %s2043_s26   ;;  %s1613_s25 = sphi %s1679_s25, %s2042_s25   ;;  %s1609_s24 = sphi %s1677_s24, %s2041_s24   ;;  %s1605_s23 = sphi %s1675_s23, %s2047_s23   ;;  %s1601_s22 = sphi %s1673_s22, %s2046_s22   ;;  %s1597_s21 = sphi %s1671_s21, %s2045_s21  }
  0x11   : > { %2018 = sst [smem:[#allocation22_spill]] %s1617_s26  ;;  %s1142_s30 = sadd.s32 4294967294, %s1625_s28  }
  0x12   : > { %2019 = sst [smem:[#allocation23_spill]] %s1621_s27  ;;  %p82_p0 = scmp.ne.s32.totalorder %s1601_s22, %s1597_s21 }
  0x13   : > { %p83_p1 = scmp.eq.s32.totalorder %s1712_s29, 0  ;;  %p206_p2 = scmp.eq.s32.totalorder %s1712_s29, 7 }
  0x14   : > { %p212_p3 = scmp.eq.s32.totalorder %s1142_s30, 7  ;;  %p1143_p5 = scmp.ge.s32.totalorder %s1625_s28, 1 }
  0x15   : > { %p1721_p4 = por %p83_p1, %p82_p0  ;;  %p219_p7 = scmp.lt.s32.totalorder %s1625_s28, 9 }
  0x16   : > { %p1726_p6 = por %p212_p3, %p82_p0  ;;  %s2023_s4 = sld [smem:[#allocation30_spill]] }
  0x17   : > { %p1734_p8 = pnand %p1143_p5, %p219_p7  ;;  %s1627_s13 = smov [#allocation12]  }
  0x18   : > { %s2021_s8 = scalar_select %p1726_p6, 1, 0 }
  0x19   : > { %p1211_p9 = pneg %p1734_p8  ;;  %s242_s14 = sshll.u32 %s1627_s13, 4  ;;  %s243_s14 = int_to_ptr.vmem [resolvable:$true] %s242_s14 }
  0x1a   : > { %2022 = sst [smem:[#allocation24_spill]] %s2021_s8  ;;  %s2001_s16 = smov 128  }
  0x1b   : > { %p1742_p10 = pnand %p1211_p9, %p83_p1  ;;  %s2003_s17 = smov 8  }
  0x1c   : > { %s240_s11 = sshll.u32 %s2023_s4, 4  ;;  %s36_s18 = sadd.s32 1, %s1617_s26  ;;  %s241_s11 = int_to_ptr.hbm [resolvable:$true] %s240_s11 }
  0x1d   : > { %1217 = dma.hbm_to_vmem [thread:$0]  (!%p1742_p10), %s241_s11, 512, %s243_s14, [#allocation13], %s2001_s16, %s2001_s16, %s2003_s17  }
  0x1e   : > { %p37_p11 = scmp.ge.s32.totalorder %s36_s18, 2  ;;  %s39_s19 = sadd.s32 1, %s1621_s27 }
  0x1f   : > { %s69_s20 = sadd.s32 1, %s1605_s23  ;;  %p76_p12 = scmp.ne.s32.totalorder %s1605_s23, %s1601_s22 }
  0x20   : > { %s2049_s18 = smov (%p37_p11, %s36_s18), 0  ;;  %s2051_s19 = smov (!%p37_p11, %s39_s19), %s1621_s27 }
  0x21   : > { %2026 = sst [smem:[#allocation25_spill]] %s2049_s18  ;;  %s65_s30 = ssub.s32 %s1617_s26, %s2049_s18 }
  0x22   : > { %p77_p13 = scmp.eq.s32.totalorder %s1625_s28, 0  ;;  %p41_p0 = scmp.ge.s32.totalorder %s2051_s19, 4 }
  0x23   : > { %p1764_p3 = por %p206_p2, %p76_p12  ;;  %p1238_p7 = scmp.lt.s32.totalorder %s1625_s28, 8 }
  0x24   : > { %p78_p5 = por %p77_p13, %p76_p12  ;;  %s2053_s19 = smov (%p41_p0, %s2051_s19), 0 }
  0x25   : > { %2028 = sst [smem:[#allocation26_spill]] %s2053_s19  ;;  %s2010_s10 = sand.u32 1, %s1605_s23  }
  0x26   : > { %s1149_s11 = sshll.u32 %s1617_s26, 1  ;;  %s64_s13 = ssub.s32 %s1621_s27, %s2053_s19 }
  0x27   : > { %s1777_s14 = sshll.u32 %s2010_s10, 4  ;;  %s66_s16 = sor.u32 %s65_s30, %s64_s13 }
  0x28   : > { %s1150_s17 = sshll.u32 %s1621_s27, 2  ;;  %p67_p9 = scmp.eq.s32.totalorder %s66_s16, 0 }
  0x29   : > { %s279_s4 = sadd.s32 %s1150_s17, %s1149_s11  ;;  %p1782_p2 = pnand %p1238_p7, %p78_p5 }
  0x2a   : > { %s1780_s18 = sshll.u32 %s279_s4, 3  ;;  %s294_s19 = sand.u32 1, %s1625_s28  }
  0x2b   : > { %s1787_s21 = scalar_select %p67_p9, %s1605_s23, %s69_s20  }
  0x2c   : > { %s2031_s2 = sld [smem:[#allocation29_spill]]  ;;  %s298_s30 = scalar_lea.vmem [#allocation9], %s1777_s14 }
  0x2d   : > { %2030 = sst [smem:[#allocation27_spill]] %s1787_s21  ;;  %s308_s16 = sshll.u32 %s298_s30, 4  ;;  %s309_s16 = int_to_ptr.vmem [resolvable:$true] %s308_s16 }
  0x2e   : > { %s1795_s4 = scalar_lea.sflag [#allocation10], %s294_s19  ;;  %s2032_s11 = smov 8  }
  0x2f   : > { %s2033_s13 = smov 128   ;;  %s2034_s0 = sld [smem:[#allocation28_spill]] }
  0x30   : > { %s1630_s10 = smov [#allocation4]   ;;  %s254_s30 = sshll.u32 %s1999_s5, 4  ;;  %s255_s30 = int_to_ptr.hbm [resolvable:$true] %s254_s30 }
  0x32   : > { %s305_s6 = scalar_lea.hbm %s2031_s2, %s1780_s18  ;;  %s1631_s2 = smov [#allocation14]  }
  0x33   : > { %s306_s17 = sshll.u32 %s305_s6, 4  ;;  %s256_s21 = sshll.u32 %s1631_s2, 4  ;;  %s307_s17 = int_to_ptr.hbm [resolvable:$true] %s306_s17  ;;  %s257_s21 = int_to_ptr.vmem [resolvable:$true] %s256_s21 }
  0x34   : > { %1227 = dma.hbm_to_vmem [thread:$0]  (!%p1782_p2), %s307_s17, 256, %s309_s16, %s1795_s4, %s2033_s13, %s2033_s13, %s2032_s11  }
  0x35   : > { %s231_s26 = sshll.u32 %s2034_s0, 4  ;;  %s281_s17 = scalar_lea.hbm %s1995_s1, %s1780_s18  ;;  %s232_s26 = int_to_ptr.hbm [resolvable:$true] %s231_s26 }
  0x36   : > { %1214 = dma.hbm_to_smem (!%p1742_p10), %s232_s26, 16, %s1630_s10, [#allocation7]  }
  0x37   : > { %1220 = dma.hbm_to_vmem [thread:$0]  (!%p1742_p10), %s255_s30, 512, %s257_s21, [#allocation13], %s2033_s13, %s2033_s13, %s2032_s11  }
  0x38   : > { %s282_s20 = sshll.u32 %s281_s17, 4  ;;  %s274_s26 = scalar_lea.vmem [#allocation8], %s1777_s14  ;;  %s283_s20 = int_to_ptr.hbm [resolvable:$true] %s282_s20 }
  0x39   : > { %s284_s10 = sshll.u32 %s274_s26, 4  ;;  %s2035_s6 = sand.u32 1, %s1605_s23   ;;  %s285_s10 = int_to_ptr.vmem [resolvable:$true] %s284_s10 }
  0x3a   : > { %s271_s19 = scalar_lea.sflag [#allocation5], %s2035_s6  ;;  %s329_s21 = scalar_lea.hbm %s1997_s3, %s1780_s18 }
  0x3b   : > { %1224 = dma.hbm_to_vmem [thread:$0]  (!%p1782_p2), %s283_s20, 256, %s285_s10, %s271_s19, %s2033_s13, %s2033_s13, %s2032_s11  }
  0x3c   : > { %s330_s30 = sshll.u32 %s329_s21, 4  ;;  %s322_s0 = scalar_lea.vmem [#allocation11], %s1777_s14  ;;  %s331_s30 = int_to_ptr.hbm [resolvable:$true] %s330_s30 }
  0x3d   : > { %s332_s27 = sshll.u32 %s322_s0, 4  ;;  %344 = sbr.rel (%p1734_p8) target bundleno = 1278 (0x4fe), region = 44  ;;  %s333_s27 = int_to_ptr.vmem [resolvable:$true] %s332_s27 }
  0x3e   : > { %1230 = dma.hbm_to_vmem [thread:$0]  (!%p1782_p2), %s331_s30, 256, %s333_s27, %s1795_s4, %s2033_s13, %s2033_s13, %s2032_s11  }
  0x42   : > { %1576 = dma.done.wait (%p83_p1), [#allocation7], 16  }
  0x43   : > { %1578 = vsyncadd (%p83_p1), [#allocation7], 4294967280  ;;  %s1846_s18 = sand.u32 1, %s1601_s22  }
  0x44   : > { %s1849_s0 = sshll.u32 %s1846_s18, 4  ;;  %s352_s8 = scalar_lea.sflag [#allocation5], %s1846_s18 }
  0x45   : > { %s355_s14 = scalar_lea.vmem [#allocation8], %s1849_s0 }
  0x46   : > { %1580 = dma.done.wait (%p1721_p4), %s352_s8, 256  }
  0x47   : > { %1582 = vsyncadd (%p1721_p4), %s352_s8, 4294967040  ;;  %s361_s12 = sand.u32 1, %s1712_s29   ;;  %s365_s11 = scalar_lea.vmem [#allocation9], %s1849_s0 }
  0x48   : > { %s362_s4 = scalar_lea.sflag [#allocation10], %s361_s12 }
  0x49   : > { %1584 = dma.done.wait (%p1721_p4), %s362_s4, 512  }
  0x4a   : > { %1586 = vsyncadd (%p1721_p4), %s362_s4, 4294966784  ;;  %s375_s13 = scalar_lea.vmem [#allocation11], %s1849_s0 }
  0x4b   : > { %1588 = dma.done.wait (%p83_p1), [#allocation13], 1024  }
  0x4c   : > { %1590 = vsyncadd (%p83_p1), [#allocation13], 4294966272 }
  0x4d   : > { %391 = sfence }
  0x4e   : > { %v454_v0 = vld [vmem:[%s365_s11] sm:$0xff]  ;;  %s1632_s16 = smov 64   ;;  %v455_v2 = vld [vmem:[%s365_s11 + $0x8] sm:$0xff]  ;;  %s1168_s7 = sshll.u32 %s1609_s24, 4 }
  0x4f   : > { %v438_v1 = vld [vmem:[%s355_s14] sm:$0xff]  ;;  %458 = vrot.lane.b32.xlu1 %v454_v0, %s1632_s16  ;;  %v439_v3 = vld [vmem:[%s355_s14 + $0x8] sm:$0xff]  ;;  %s432_s29 = scalar_lea.vmem [#allocation12], %s1168_s7  ;;  %s435_s17 = scalar_lea.vmem [#allocation14], %s1168_s7 }
  0x50   : > { %442 = vrot.lane.b32.xlu0 %v438_v1, %s1632_s16  ;;  %v470_v4 = vld [vmem:[%s375_s13] sm:$0xff]  ;;  %v471_v5 = vld [vmem:[%s375_s13 + $0x8] sm:$0xff]  ;;  %s1882_s20 = scalar_lea.vmem [#allocation15], %s1849_s0  ;;  %p1169_p1 = scmp.ne.s32.totalorder %s1609_s24, 0 }
  0x51   : > { %v1868_v6 = vpack.c.bf16 %v470_v4, %v470_v4  ;;  %v1870_v7 = vpack.c.bf16 %v471_v5, %v471_v5  ;;  %v433_v8 = vld [vmem:[%s432_s29] sm:$0xff]  ;;  %v434_v18 = vld [vmem:[%s432_s29 + $0x8] sm:$0xff] }
  0x52   : > { %v436_v9 = vld [vmem:[%s435_s17] sm:$0xff]  ;;  %v464_v10 = vmul.f32 %v454_v0, %v433_v8  ;;  %v448_v11 = vmul.f32 %v438_v1, %v433_v8  ;;  %v437_v19 = vld [vmem:[%s435_s17 + $0x8] sm:$0xff]  ;;  %v465_v20 = vmul.f32 %v455_v2, %v434_v18  ;;  %v449_v21 = vmul.f32 %v439_v3, %v434_v18 }
  0x57   : > { %460 = vrot.lane.b32.xlu1 %v455_v2, %s1632_s16 }
  0x58   : > { %444 = vrot.lane.b32.xlu0 %v439_v3, %s1632_s16 }
  0xc1   : > { %v459_v12 = vpop.permute.xlu1 %458 }
  0xc2   : > { %v443_v13 = vpop.permute.xlu0 %442  ;;  %v466_v14 = vmul.f32 %v459_v12, %v436_v9 }
  0xc3   : > { %v450_v15 = vmul.f32 %v443_v13, %v436_v9 }
  0xc4   : > { %v1873_v16 = vadd.f32 %v466_v14, %v464_v10 }
  0xc5   : > { %v1875_v17 = vadd.f32 %v450_v15, %v448_v11 }
  0xc9   : > { %v461_v22 = vpop.permute.xlu1 %460  ;;  %477 = sbr.rel (%p1169_p1) target bundleno = 224 (0xe0), region = 72 }
  0xca   : > { %v445_v23 = vpop.permute.xlu0 %444  ;;  %v467_v24 = vmul.f32 %v461_v22, %v437_v19 }
  0xcb   : > { %v451_v25 = vmul.f32 %v445_v23, %v437_v19 }
  0xcc   : > { %v1877_v26 = vadd.f32 %v467_v24, %v465_v20 }
  0xcd   : > { %v1879_v27 = vadd.f32 %v451_v25, %v449_v21 }
  0xce   : > { %v1633_v28 = vmov 0.0  }
  0xcf   : > { %478 = vst [vmem:[#allocation2 + $0x30] sm:$0xff] %v1633_v28 }
  0xd0   : > { %479 = vst [vmem:[#allocation2] sm:$0xff] %v1633_v28 }
  0xd1   : > { %480 = vst [vmem:[#allocation2 + $0x58] sm:$0xff] %v1633_v28 }
  0xd2   : > { %481 = vst [vmem:[#allocation2 + $0x18] sm:$0xff] %v1633_v28 }
  0xd3   : > { %482 = vst [vmem:[#allocation2 + $0x50] sm:$0xff] %v1633_v28 }
  0xd4   : > { %483 = vst [vmem:[#allocation2 + $0x68] sm:$0xff] %v1633_v28 }
  0xd5   : > { %484 = vst [vmem:[#allocation2 + $0x8] sm:$0xff] %v1633_v28 }
  0xd6   : > { %485 = vst [vmem:[#allocation2 + $0x48] sm:$0xff] %v1633_v28 }
  0xd7   : > { %486 = vst [vmem:[#allocation2 + $0x40] sm:$0xff] %v1633_v28 }
  0xd8   : > { %487 = vst [vmem:[#allocation2 + $0x20] sm:$0xff] %v1633_v28 }
  0xd9   : > { %488 = vst [vmem:[#allocation2 + $0x10] sm:$0xff] %v1633_v28 }
  0xda   : > { %489 = vst [vmem:[#allocation2 + $0x38] sm:$0xff] %v1633_v28 }
  0xdb   : > { %490 = vst [vmem:[#allocation2 + $0x60] sm:$0xff] %v1633_v28 }
  0xdc   : > { %491 = vst [vmem:[#allocation2 + $0x70] sm:$0xff] %v1633_v28 }
  0xdd   : > { %492 = vst [vmem:[#allocation2 + $0x78] sm:$0xff] %v1633_v28 }
  0xde   : > { %493 = vst [vmem:[#allocation2 + $0x28] sm:$0xff] %v1633_v28 }
  0xdf   : > { %494 = vst [vmem:[#allocation3] sm:$0x1] %v1633_v28 }
  0xe0 PF: > { %v498_v29 = vpack.c.bf16 %v1873_v16, %v1873_v16  ;;  %v499_v30 = vpack.c.bf16 %v1877_v26, %v1877_v26  ;;  %v495_v31 = vmul.f32 0.088388346, %v1875_v17  ;;  %v496_v32 = vmul.f32 0.088388346, %v1879_v27  ;;  %s1906_s26 = sld [smem:[#allocation4 + %s1613_s25]] }
  0xe1   : > { %vm514_vm0 = vcmask 64512   ;;  %vm547_vm1 = vcmask 1043456  }
  0xe2   : > { %507 = vmatpush.bf16.xpose.msra.mxu0 %v498_v29  ;;  %574 = vmatpush.bf16.xpose.msra.mxu2 %v499_v30  ;;  %v497_v33 = vpack.c.bf16 %v496_v32, %v495_v31  ;;  %v549_v42 = vsel %vm547_vm1, %v1868_v6, 0  ;;  %v618_v43 = vsel %vm547_vm1, %v1870_v7, 0 }
  0xe3   : > { %558 = vmatpush.bf16.msra.mxu1 %v549_v42  ;;  %627 = vmatpush.bf16.msra.mxu3 %v618_v43 }
  0xe6   : > { %s672_s10 = ssub.f32 (!%p1169_p1), 1.0, %s1906_s26 }
  0xe9   : > { %508 = vmatmul.bf16.vlgmr.msra.gmra.mxu0 %v497_v33  ;;  %575 = vmatmul.bf16.vlgmr.msra.gmra.mxu2 %v497_v33 }
 0x166   : > { %v509_v34 = vpop.f32.mrf.mxu0 }
 0x167   : > { %v515_v35 = vsel %vm514_vm0, %v509_v34, -inf }
 0x168   : > { %516 = vmax.xlane.f32.xlu0 %v515_v35 }
 0x16c   : > { %v576_v36 = vpop.f32.mrf.mxu2 }
 0x16d   : > { %v581_v37 = vsel %vm514_vm0, %v576_v36, -inf }
 0x16e   : > { %582 = vmax.xlane.f32.xlu1 %v581_v37  ;;  %v511_v38 = vpop.f32.mrf.mxu0 }
 0x16f   : > { %v518_v39 = vsel %vm514_vm0, %v511_v38, -inf }
 0x170   : > { %519 = vmax.xlane.f32.xlu0 %v518_v39 }
 0x174   : > { %v578_v40 = vpop.f32.mrf.mxu2 }
 0x175   : > { %v584_v41 = vsel %vm514_vm0, %v578_v40, -inf }
 0x176   : > { %585 = vmax.xlane.f32.xlu1 %v584_v41 }
 0x1db   : > { %v517_v44 = vpop.xlane.xlu0 %516 }
 0x1dc   : > { %v527_v45 = vsub.f32 %v509_v34, %v517_v44  ;;  %v521_v5 = vsub.f32 -inf, %v517_v44 }
 0x1de   : > { %v529_v46 = vmul.f32 1.442695, %v527_v45  ;;  %v523_v8 = vmul.f32 1.442695, %v521_v5 }
 0x1e0   : > { %1317 = vpow2.f32 %v529_v46 }
 0x1e1   : > { %v583_v47 = vpop.xlane.xlu1 %582 }
 0x1e2   : > { %v587_v48 = vmax.f32 %v517_v44, %v583_v47 }
 0x1e3   : > { %v520_v49 = vpop.xlane.xlu0 %519 }
 0x1e4   : > { %v589_v50 = vsub.f32 %v517_v44, %v587_v48  ;;  %v595_v51 = vsub.f32 %v576_v36, %v587_v48  ;;  %v528_v52 = vsub.f32 %v511_v38, %v520_v49  ;;  %v522_v10 = vsub.f32 -inf, %v520_v49 }
 0x1e6   : > { %v1318_v53 = vpop.eup %1317  ;;  %v597_v54 = vmul.f32 1.442695, %v595_v51  ;;  %v531_v55 = vmul.f32 1.442695, %v528_v52  ;;  %v591_v9 = vmul.f32 1.442695, %v589_v50 }
 0x1e7   : > { %v535_v56 = vsel %vm514_vm0, %v1318_v53, 0.0  ;;  %v525_v12 = vmul.f32 1.442695, %v522_v10 }
 0x1e8   : > { %536 = vadd.xlane.f32.xlu2 %v535_v56  ;;  %1319 = vpow2.f32 %v597_v54 }
 0x1e9   : > { %v586_v57 = vpop.xlane.xlu1 %585  ;;  %1321 = vpow2.f32 %v531_v55 }
 0x1ea   : > { %v588_v58 = vmax.f32 %v520_v49, %v586_v57 }
 0x1ec   : > { %v596_v59 = vsub.f32 %v578_v40, %v588_v58  ;;  %v590_v15 = vsub.f32 %v520_v49, %v588_v58 }
 0x1ee   : > { %v599_v60 = vmul.f32 1.442695, %v596_v59  ;;  %v1320_v61 = vpop.eup %1319  ;;  %v593_v21 = vmul.f32 1.442695, %v590_v15 }
 0x1ef   : > { %v1322_v62 = vpop.eup %1321  ;;  %v603_v63 = vsel %vm514_vm0, %v1320_v61, 0.0 }
 0x1f0   : > { %1323 = vpow2.f32 %v599_v60  ;;  %604 = vadd.xlane.f32.xlu0 %v603_v63  ;;  %v538_v0 = vsel %vm514_vm0, %v1322_v62, 0.0  ;;  %v543_v1 = vpack.c.bf16 %v1322_v62, %v1318_v53 }
 0x1f1   : > { %539 = vadd.xlane.f32.xlu2 %v538_v0  ;;  %1325 = vpow2.f32 %v523_v8 }
 0x1f2   : > { %1170 = vmatmul.msk.bf16.vlgmr.msra.gmra.mxu1 %vm514_vm0, %v543_v1  ;;  %1327 = vpow2.f32 %v591_v9 }
 0x1f3   : > { %1329 = vpow2.f32 %v525_v12 }
 0x1f4   : > { %1331 = vpow2.f32 %v593_v21 }
 0x1f6   : > { %v1324_v2 = vpop.eup %1323 }
 0x1f7   : > { %v606_v3 = vsel %vm514_vm0, %v1324_v2, 0.0  ;;  %v613_v4 = vpack.c.bf16 %v1324_v2, %v1320_v61  ;;  %v1326_v11 = vpop.eup %1325 }
 0x1f8   : > { %607 = vadd.xlane.f32.xlu1 %v606_v3  ;;  %v533_v13 = vmul.f32 0.0, %v1326_v11  ;;  %v1328_v19 = vpop.eup %1327 }
 0x1f9   : > { %1171 = vmatmul.msk.bf16.vlgmr.msra.gmra.mxu3 %vm514_vm0, %v613_v4  ;;  %v1330_v22 = vpop.eup %1329 }
 0x1fa   : > { %v534_v25 = vmul.f32 0.0, %v1330_v22  ;;  %v1332_v30 = vpop.eup %1331 }
 0x25b   : > { %v537_v14 = vpop.xlane.xlu2 %536 }
 0x25c   : > { %v541_v18 = vadd.f32 %v537_v14, %v533_v13 }
 0x25e   : > { %v601_v20 = vmul.f32 %v1328_v19, %v541_v18 }
 0x263   : > { %v605_v23 = vpop.xlane.xlu0 %604 }
 0x264   : > { %v540_v24 = vpop.xlane.xlu2 %539  ;;  %v609_v28 = vadd.f32 %v605_v23, %v601_v20 }
 0x265   : > { %v542_v29 = vadd.f32 %v540_v24, %v534_v25 }
 0x266   : > { %1333 = vrcp.f32 %v609_v28  ;;  %v647_v45 = vand.u32 2147483648, %v609_v28  ;;  %vm641_vm3 = vweird.f32 %v609_v28  ;;  %v645_v46 = vand.u32 2147483647, %v609_v28 }
 0x267   : > { %v602_v31 = vmul.f32 %v1332_v30, %v542_v29 }
 0x268   : > { %v648_v51 = vor.u32 1.1754944e-38, %v647_v45  ;;  %vm646_vm5 = vcmp.eq.f32.partialorder %v645_v46, 8.507059e+37 }
 0x26b   : > { %v608_v32 = vpop.xlane.xlu1 %607 }
 0x26c   : > { %v1334_v33 = vpop.eup %1333  ;;  %v610_v34 = vadd.f32 %v608_v32, %v602_v31 }
 0x26d   : > { %v637_v35 = vmul.f32 %v1334_v33, %v609_v28  ;;  %vm642_vm2 = vweird.f32 %v1334_v33 }
 0x26e   : > { %1335 = vrcp.f32 %v610_v34  ;;  %vm643_vm4 = vmor %vm641_vm3, %vm642_vm2  ;;  %v662_v57 = vand.u32 2147483648, %v610_v34  ;;  %vm656_vm7 = vweird.f32 %v610_v34  ;;  %v660_v58 = vand.u32 2147483647, %v610_v34 }
 0x26f   : > { %v638_v36 = vsub.f32 1.0, %v637_v35  ;;  %v560_v37 = vpop.f32.mrf.mxu1 }
 0x270   : > { %v565_v38 = vadd.f32 %v560_v37, %v533_v13  ;;  %v663_v62 = vor.u32 1.1754944e-38, %v662_v57  ;;  %vm661_vm9 = vcmp.eq.f32.partialorder %v660_v58, 8.507059e+37 }
 0x271   : > { %v639_v40 = vmul.f32 %v1334_v33, %v638_v36 }
 0x272   : > { %v611_v39 = vmul.f32 %v1328_v19, %v565_v38 }
 0x273   : > { %v640_v44 = vadd.f32 %v1334_v33, %v639_v40 }
 0x274   : > { %v1336_v41 = vpop.eup %1335 }
 0x275   : > { %v652_v42 = vmul.f32 %v1336_v41, %v610_v34  ;;  %v644_v47 = vsel %vm643_vm4, %v1334_v33, %v640_v44  ;;  %vm657_vm6 = vweird.f32 %v1336_v41 }
 0x276   : > { %v649_v53 = vsel %vm646_vm5, %v648_v51, %v644_v47  ;;  %vm658_vm8 = vmor %vm656_vm7, %vm657_vm6 }
 0x277   : > { %v653_v43 = vsub.f32 1.0, %v652_v42  ;;  %v562_v49 = vpop.f32.mrf.mxu1 }
 0x278   : > { %v566_v54 = vadd.f32 %v562_v49, %v534_v25 }
 0x279   : > { %v654_v48 = vmul.f32 %v1336_v41, %v653_v43 }
 0x27a   : > { %v612_v59 = vmul.f32 %v1332_v30, %v566_v54 }
 0x27b   : > { %v655_v56 = vadd.f32 %v1336_v41, %v654_v48 }
 0x27c   : > { %v629_v50 = vpop.f32.mrf.mxu3 }
 0x27d   : > { %v634_v52 = vadd.f32 %v629_v50, %v611_v39  ;;  %v659_v60 = vsel %vm658_vm8, %v1336_v41, %v655_v56 }
 0x27e   : > { %v664_v0 = vsel %vm661_vm9, %v663_v62, %v659_v60 }
 0x27f   : > { %v1908_v55 = vmul.f32 %v649_v53, %v634_v52 }
 0x283   : > { %671 = sbr.rel (%p1169_p1) target bundleno = 653 (0x28d), region = 76 }
 0x284   : > { %v631_v61 = vpop.f32.mrf.mxu3 }
 0x285   : > { %v635_v63 = vadd.f32 %v631_v61, %v612_v59 }
 0x287   : > { %v1910_v1 = vmul.f32 %v664_v0, %v635_v63 }
 0x288   : > { %v673_v2 = vstv %s672_s10 }
 0x289   : > { %v674_v3 = vmul.f32 %v673_v2, %v1908_v55  ;;  %v675_v4 = vmul.f32 %v673_v2, %v1910_v1 }
 0x28b   : > { %676 = vst [vmem:[%s1882_s20] sm:$0xff] %v674_v3 }
 0x28c   : > { %677 = vst [vmem:[%s1882_s20 + $0x8] sm:$0xff] %v675_v4 }
 0x28d PF: > { %p1173_p4 = scmp.le.s32.totalorder %s1609_s24, 0 }
 0x28f   : > { %681 = sbr.rel (%p1173_p4) target bundleno = 837 (0x345), region = 80 }
 0x294   : > { %v707_v5 = vld [vmem:[#allocation2 + $0x78] sm:$0xff]  ;;  %v708_v8 = vld [vmem:[#allocation2 + $0x28] sm:$0xff]  ;;  %v705_v9 = vld [vmem:[#allocation2 + $0x60] sm:$0xff]  ;;  %v686_v12 = vmul.f32 1.442695, %v1875_v17  ;;  %v684_v19 = vadd.f32 1.0, %v1875_v17 }
 0x295   : > { %v716_v10 = vpack.c.bf16 %v708_v8, %v707_v5  ;;  %v706_v11 = vld [vmem:[#allocation2 + $0x70] sm:$0xff]  ;;  %v688_v14 = vmul.f32 1.442695, %v1879_v27  ;;  %v704_v18 = vld [vmem:[#allocation2 + $0x38] sm:$0xff]  ;;  %vm682_vm10 = vcmp.gt.f32.partialorder %v1875_v17, 0.0  ;;  %v701_v22 = vld [vmem:[#allocation2 + $0x40] sm:$0xff]  ;;  %v777_v8 = vstv %s1906_s26 }
 0x296   : > { %v715_v13 = vpack.c.bf16 %v706_v11, %v705_v9  ;;  %1338 = vpow2.f32 %v686_v12  ;;  %v703_v15 = vld [vmem:[#allocation2 + $0x10] sm:$0xff]  ;;  %v1337_v21 = vld [vmem:[#allocation3] ss:$0 sm:$0xff]  ;;  %v685_v28 = vadd.f32 1.0, %v1879_v27  ;;  %vm683_vm11 = vcmp.gt.f32.partialorder %v1879_v27, 0.0  ;;  %v699_v32 = vld [vmem:[#allocation2 + $0x8] sm:$0xff] }
 0x297   : > { %717 = vmatpush.bf16.msra.mxu0 %v716_v10  ;;  %1340 = vpow2.f32 %v688_v14  ;;  %v714_v20 = vpack.c.bf16 %v704_v18, %v703_v15  ;;  %v702_v23 = vld [vmem:[#allocation2 + $0x20] sm:$0xff]  ;;  %v700_v33 = vld [vmem:[#allocation2 + $0x48] sm:$0xff]  ;;  %v697_v17 = vld [vmem:[#allocation2 + $0x50] sm:$0xff] }
 0x298   : > { %v713_v31 = vpack.c.bf16 %v702_v23, %v701_v22  ;;  %v712_v35 = vpack.c.bf16 %v700_v33, %v699_v32  ;;  %v698_v36 = vld [vmem:[#allocation2 + $0x68] sm:$0xff]  ;;  %v695_v39 = vld [vmem:[#allocation2 + $0x58] sm:$0xff]  ;;  %v693_v42 = vld [vmem:[#allocation2 + $0x30] sm:$0xff] }
 0x299   : > { %v711_v38 = vpack.c.bf16 %v698_v36, %v697_v17  ;;  %v696_v40 = vld [vmem:[#allocation2 + $0x18] sm:$0xff]  ;;  %v694_v43 = vld [vmem:[#allocation2] sm:$0xff] }
 0x29a   : > { %v710_v41 = vpack.c.bf16 %v696_v40, %v695_v39  ;;  %v709_v27 = vpack.c.bf16 %v694_v43, %v693_v42 }
 0x29b   : > { %718 = vmatpush.bf16.msra.mxu0 %v715_v13 }
 0x29c   : > { %v1339_v24 = vpop.eup %1338 }
 0x29d   : > { %v690_v25 = vsel %vm682_vm10, %v684_v19, %v1339_v24  ;;  %v1341_v29 = vpop.eup %1340 }
 0x29e   : > { %v735_v30 = vmul.f32 %v1337_v21, %v690_v25  ;;  %v691_v34 = vsel %vm683_vm11, %v685_v28, %v1341_v29 }
 0x29f   : > { %719 = vmatpush.bf16.msra.mxu0 %v714_v20  ;;  %v736_v37 = vmul.f32 %v1337_v21, %v691_v34  ;;  %v692_v44 = vpack.c.bf16 %v691_v34, %v690_v25 }
 0x2a0   : > { %737 = vadd.xlane.f32.xlu0 %v735_v30 }
 0x2a3   : > { %720 = vmatpush.bf16.msra.mxu0 %v713_v31 }
 0x2a7   : > { %721 = vmatpush.bf16.msra.mxu0 %v712_v35 }
 0x2a8   : > { %739 = vadd.xlane.f32.xlu0 %v736_v37 }
 0x2ab   : > { %722 = vmatpush.bf16.msra.mxu0 %v711_v38 }
 0x2af   : > { %723 = vmatpush.bf16.msra.mxu0 %v710_v41 }
 0x2b3   : > { %724 = vmatpush.bf16.msra.mxu0 %v709_v27 }
 0x2b6   : > { %725 = vmatmul.bf16.vlgmr.msra.gmra.mxu0 %v692_v44 }
 0x313   : > { %v738_v45 = vpop.xlane.xlu0 %737 }
 0x314   : > { %v741_v46 = vadd.f32 1e-06, %v738_v45 }
 0x316   : > { %1342 = vrcp.f32 %v741_v46  ;;  %vm748_vm12 = vweird.f32 %v741_v46  ;;  %v754_v56 = vand.u32 2147483648, %v741_v46  ;;  %v752_v58 = vand.u32 2147483647, %v741_v46 }
 0x318   : > { %v755_v60 = vor.u32 1.1754944e-38, %v754_v56  ;;  %vm753_vm15 = vcmp.eq.f32.partialorder %v752_v58, 8.507059e+37 }
 0x31b   : > { %v740_v47 = vpop.xlane.xlu0 %739 }
 0x31c   : > { %v1343_v48 = vpop.eup %1342  ;;  %v742_v49 = vadd.f32 1e-06, %v740_v47 }
 0x31d   : > { %v744_v50 = vmul.f32 %v1343_v48, %v741_v46  ;;  %vm749_vm13 = vweird.f32 %v1343_v48 }
 0x31e   : > { %1344 = vrcp.f32 %v742_v49  ;;  %vm750_vm14 = vmor %vm748_vm12, %vm749_vm13  ;;  %vm763_vm0 = vweird.f32 %v742_v49  ;;  %v769_v2 = vand.u32 2147483648, %v742_v49  ;;  %v767_v5 = vand.u32 2147483647, %v742_v49 }
 0x31f   : > { %v745_v51 = vsub.f32 1.0, %v744_v50 }
 0x320   : > { %v770_v10 = vor.u32 1.1754944e-38, %v769_v2  ;;  %vm768_vm3 = vcmp.eq.f32.partialorder %v767_v5, 8.507059e+37 }
 0x321   : > { %v746_v54 = vmul.f32 %v1343_v48, %v745_v51 }
 0x323   : > { %v747_v57 = vadd.f32 %v1343_v48, %v746_v54 }
 0x324   : > { %v1345_v52 = vpop.eup %1344 }
 0x325   : > { %v759_v53 = vmul.f32 %v1345_v52, %v742_v49  ;;  %v751_v61 = vsel %vm750_vm14, %v1343_v48, %v747_v57  ;;  %vm764_vm1 = vweird.f32 %v1345_v52 }
 0x326   : > { %v756_v0 = vsel %vm753_vm15, %v755_v60, %v751_v61  ;;  %vm765_vm2 = vmor %vm763_vm0, %vm764_vm1 }
 0x327   : > { %v760_v59 = vsub.f32 1.0, %v759_v53 }
 0x329   : > { %v761_v62 = vmul.f32 %v1345_v52, %v760_v59 }
 0x32b   : > { %v762_v4 = vadd.f32 %v1345_v52, %v761_v62 }
 0x32d   : > { %v766_v12 = vsel %vm765_vm2, %v1345_v52, %v762_v4 }
 0x32e   : > { %v771_v15 = vsel %vm768_vm3, %v770_v10, %v766_v12 }
 0x333   : > { %v726_v63 = vpop.f32.mrf.mxu0 }
 0x334   : > { %v773_v3 = vmul.f32 %v756_v0, %v726_v63 }
 0x336   : > { %v775_v9 = vsub.f32 %v773_v3, %v1908_v55 }
 0x338   : > { %v778_v11 = vmul.f32 %v777_v8, %v775_v9 }
 0x33a   : > { %v780_v13 = vadd.f32 %v778_v11, %v1908_v55 }
 0x33b   : > { %v728_v14 = vpop.f32.mrf.mxu0 }
 0x33c   : > { %782 = vst [vmem:[%s1882_s20] sm:$0xff] %v780_v13  ;;  %v774_v18 = vmul.f32 %v771_v15, %v728_v14 }
 0x33e   : > { %v776_v19 = vsub.f32 %v774_v18, %v1910_v1 }
 0x340   : > { %v779_v20 = vmul.f32 %v777_v8, %v776_v19 }
 0x342   : > { %v781_v21 = vadd.f32 %v779_v20, %v1910_v1 }
 0x344   : > { %783 = vst [vmem:[%s1882_s20 + $0x8] sm:$0xff] %v781_v21 }
 0x345 PF: > { %v788_v22 = vmul.f32 1.442695, %v1873_v16  ;;  %v790_v23 = vmul.f32 1.442695, %v1877_v26  ;;  %v829_v24 = vunpack.c.l.b16 %v1868_v6  ;;  %v830_v25 = vunpack.c.l.b16 %v1870_v7  ;;  %v939_v37 = vld [vmem:[#allocation3] sm:$0x1] }
 0x346   : > { %v786_v28 = vadd.f32 1.0, %v1873_v16  ;;  %vm784_vm4 = vcmp.gt.f32.partialorder %v1873_v16, 0.0  ;;  %v787_v1 = vadd.f32 1.0, %v1877_v26  ;;  %vm785_vm5 = vcmp.gt.f32.partialorder %v1877_v26, 0.0  ;;  %s1183_s6 = sshll.u32 %s1609_s24, 1  ;;  %s1184_s19 = sshll.u32 %s1613_s25, 2 }
 0x347   : > { %1346 = vpow2.f32 %v788_v22  ;;  %v831_v55 = vpack.c.b16 %v830_v25, %v829_v24  ;;  %vm833_vm6 = vcmask 130048   ;;  %s961_s2 = sadd.s32 %s1184_s19, %s1183_s6  ;;  %v794_v45 = vld [vmem:[#allocation2 + $0x30] sm:$0xff]  ;;  %s2036_s27 = sld [smem:[#allocation31_spill]] }
 0x348   : > { %1348 = vpow2.f32 %v790_v23  ;;  %s1185_s15 = sshll.u32 %s961_s2, 3  ;;  %s964_s14 = sshll.u32 %s1882_s20, 4  ;;  %s965_s14 = int_to_ptr.vmem [resolvable:$true] %s964_s14 }
 0x349   : > { %865 = vmatpush.bf16.msra.mxu0 %v831_v55  ;;  %1188 = vmatpush.bf16.msra.mxu1 %v831_v55  ;;  %s950_s4 = scalar_lea.sflag [#allocation6], %s1846_s18 }
 0x34a   : > { %1189 = vmatpush.bf16.msra.mxu2 %v831_v55  ;;  %1190 = vmatpush.bf16.msra.mxu3 %v831_v55 }
 0x34d   : > { %v1347_v29 = vpop.eup %1346  ;;  %s2037_s0 = smov %s2036_s27  ;;  %s963_s8 = scalar_lea.hbm %s2036_s27, %s1185_s15 }
 0x34e   : > { %v1349_v30 = vpop.eup %1348  ;;  %v792_v6 = vsel %vm784_vm4, %v786_v28, %v1347_v29  ;;  %s966_s12 = sshll.u32 %s963_s8, 4  ;;  %s1535_s16 = scalar_lea.hbm %s2037_s0, 128  ;;  %s967_s12 = int_to_ptr.hbm [resolvable:$true] %s966_s12 }
 0x34f   : > { %v793_v31 = vsel %vm785_vm5, %v787_v1, %v1349_v30  ;;  %s1529_s11 = sshra.s32 %s967_s12, 4  ;;  %s1530_s11 = int_to_ptr.hbm [resolvable:$true] %s1529_s11 }
 0x350   : > { %v810_v7 = vpack.c.bf16 %v793_v31, %v792_v6  ;;  %v940_v32 = vadd.f32 %v793_v31, %v792_v6  ;;  %s1531_s24 = scalar_lea.hbm %s1530_s11, 16  ;;  %p1536_p12 = scmp.lt.s32.totalorder %s1530_s11, %s2037_s0 }
 0x351   : > { %p1532_p8 = scmp.ne.s32.totalorder %s1530_s11, %s1531_s24  ;;  %p1537_p13 = scmp.lt.s32.totalorder %s1535_s16, %s1531_s24 }
 0x352   : > { %v941_v33 = vrot.slane %v940_v32, 4  ;;  %811 = vxpose.xlu0.c.b16.start.end [1/1] (short) %v810_v7, 128 }
 0x353   : > { %p1533_p10 = pnand %p1532_p8, %p1764_p3  ;;  %p1538_p0 = por %p1537_p13, %p1536_p12 }
 0x354   : > { %v942_v34 = vadd.f32 %v941_v33, %v940_v32 }
 0x355   : > { %p1534_p11 = pneg %p1533_p10 }
 0x356   : > { %v943_v35 = vrot.slane %v942_v34, 2 }
 0x357   : > { %p1539_p5 = pnand %p1538_p0, %p1534_p11 }
 0x358   : > { %v944_v17 = vadd.f32 %v943_v35, %v942_v34 }
 0x35a   : > { %v945_v36 = vrot.slane %v944_v17, 1 }
 0x35c   : > { %v946_v16 = vadd.f32 %v945_v36, %v944_v17 }
 0x35e   : > { %v947_v38 = vadd.f32 %v946_v16, %v939_v37 }
 0x360   : > { %948 = vst [vmem:[#allocation3] sm:$0x1] %v947_v38 }
 0x3fe   : > { %v819_v39 = vpop.trf.xlu0 }
 0x3ff   : > { %1174 = vmatmul.msk.bf16.vlgmr.msra.gmra.mxu0 %vm833_vm6, %v819_v39 }
 0x40e   : > { %v820_v26 = vpop.trf.xlu0 }
 0x40f   : > { %1175 = vmatmul.msk.bf16.gmra.mxu0 %vm833_vm6, %v820_v26 }
 0x41e   : > { %v821_v40 = vpop.trf.xlu0 }
 0x41f   : > { %1176 = vmatmul.msk.bf16.vlgmr.msra.gmra.mxu1 %vm833_vm6, %v821_v40 }
 0x42e   : > { %v822_v41 = vpop.trf.xlu0 }
 0x42f   : > { %1177 = vmatmul.msk.bf16.gmra.mxu1 %vm833_vm6, %v822_v41 }
 0x43e   : > { %v823_v42 = vpop.trf.xlu0 }
 0x43f   : > { %1178 = vmatmul.msk.bf16.vlgmr.msra.gmra.mxu2 %vm833_vm6, %v823_v42 }
 0x44e   : > { %v824_v43 = vpop.trf.xlu0 }
 0x44f   : > { %1179 = vmatmul.msk.bf16.gmra.mxu2 %vm833_vm6, %v824_v43 }
 0x45e   : > { %v825_v27 = vpop.trf.xlu0 }
 0x45f   : > { %1180 = vmatmul.msk.bf16.vlgmr.msra.gmra.mxu3 %vm833_vm6, %v825_v27 }
 0x46e   : > { %v826_v44 = vpop.trf.xlu0 }
 0x46f   : > { %1181 = vmatmul.msk.bf16.gmra.mxu3 %vm833_vm6, %v826_v44 }
 0x47c   : > { %v867_v46 = vpop.f32.mrf.mxu0 }
 0x47d   : > { %v907_v47 = vadd.f32 %v867_v46, %v794_v45 }
 0x47f   : > { %923 = vst [vmem:[#allocation2 + $0x30] sm:$0xff] %v907_v47 }
 0x480   : > { %1542 = shalt.err (!%p1539_p5)
}
 0x481   : > { %s1634_s18 = smov 128   ;;  %s1635_s17 = smov 8   ;;  %v795_v48 = vld [vmem:[#allocation2] sm:$0xff]  ;;  %v796_v51 = vld [vmem:[#allocation2 + $0x58] sm:$0xff]  ;;  %v798_v58 = vld [vmem:[#allocation2 + $0x50] sm:$0xff] }
 0x482   : > { %1209 = dma.vmem_to_hbm [thread:$0]  (%p1764_p3), %s965_s14, 256, %s967_s12, %s950_s4, %s1634_s18, %s1634_s18, %s1635_s17   ;;  %v797_v54 = vld [vmem:[#allocation2 + $0x18] sm:$0xff]  ;;  %v799_v61 = vld [vmem:[#allocation2 + $0x68] sm:$0xff]  ;;  %v802_v9 = vld [vmem:[#allocation2 + $0x40] sm:$0xff] }
 0x483   : > { %v800_v0 = vld [vmem:[#allocation2 + $0x8] sm:$0xff]  ;;  %v803_v12 = vld [vmem:[#allocation2 + $0x20] sm:$0xff]  ;;  %v804_v15 = vld [vmem:[#allocation2 + $0x10] sm:$0xff] }
 0x484   : > { %v869_v49 = vpop.f32.mrf.mxu0  ;;  %v801_v4 = vld [vmem:[#allocation2 + $0x48] sm:$0xff]  ;;  %v805_v20 = vld [vmem:[#allocation2 + $0x38] sm:$0xff]  ;;  %v806_v23 = vld [vmem:[#allocation2 + $0x60] sm:$0xff] }
 0x485   : > { %v908_v50 = vadd.f32 %v869_v49, %v795_v48  ;;  %v807_v55 = vld [vmem:[#allocation2 + $0x70] sm:$0xff]  ;;  %v808_v29 = vld [vmem:[#allocation2 + $0x78] sm:$0xff]  ;;  %v809_v31 = vld [vmem:[#allocation2 + $0x28] sm:$0xff] }
 0x487   : > { %924 = vst [vmem:[#allocation2] sm:$0xff] %v908_v50 }
 0x48c   : > { %v872_v52 = vpop.f32.mrf.mxu0 }
 0x48d   : > { %v909_v53 = vadd.f32 %v872_v52, %v796_v51 }
 0x48f   : > { %925 = vst [vmem:[#allocation2 + $0x58] sm:$0xff] %v909_v53 }
 0x494   : > { %v874_v56 = vpop.f32.mrf.mxu0 }
 0x495   : > { %v910_v57 = vadd.f32 %v874_v56, %v797_v54 }
 0x497   : > { %926 = vst [vmem:[#allocation2 + $0x18] sm:$0xff] %v910_v57 }
 0x49c   : > { %v877_v59 = vpop.f32.mrf.mxu1 }
 0x49d   : > { %v911_v60 = vadd.f32 %v877_v59, %v798_v58 }
 0x49f   : > { %927 = vst [vmem:[#allocation2 + $0x50] sm:$0xff] %v911_v60 }
 0x4a4   : > { %v879_v62 = vpop.f32.mrf.mxu1 }
 0x4a5   : > { %v912_v63 = vadd.f32 %v879_v62, %v799_v61 }
 0x4a7   : > { %928 = vst [vmem:[#allocation2 + $0x68] sm:$0xff] %v912_v63 }
 0x4ac   : > { %v882_v2 = vpop.f32.mrf.mxu1 }
 0x4ad   : > { %v913_v3 = vadd.f32 %v882_v2, %v800_v0 }
 0x4af   : > { %929 = vst [vmem:[#allocation2 + $0x8] sm:$0xff] %v913_v3 }
 0x4b4   : > { %v884_v5 = vpop.f32.mrf.mxu1 }
 0x4b5   : > { %v914_v8 = vadd.f32 %v884_v5, %v801_v4 }
 0x4b7   : > { %930 = vst [vmem:[#allocation2 + $0x48] sm:$0xff] %v914_v8 }
 0x4c2   : > { %v887_v10 = vpop.f32.mrf.mxu2 }
 0x4c3   : > { %v915_v11 = vadd.f32 %v887_v10, %v802_v9 }
 0x4c5   : > { %931 = vst [vmem:[#allocation2 + $0x40] sm:$0xff] %v915_v11 }
 0x4ca   : > { %v889_v13 = vpop.f32.mrf.mxu2 }
 0x4cb   : > { %v916_v14 = vadd.f32 %v889_v13, %v803_v12 }
 0x4cd   : > { %932 = vst [vmem:[#allocation2 + $0x20] sm:$0xff] %v916_v14 }
 0x4d2   : > { %v892_v18 = vpop.f32.mrf.mxu2 }
 0x4d3   : > { %v917_v19 = vadd.f32 %v892_v18, %v804_v15 }
 0x4d5   : > { %933 = vst [vmem:[#allocation2 + $0x10] sm:$0xff] %v917_v19 }
 0x4da   : > { %v894_v21 = vpop.f32.mrf.mxu2 }
 0x4db   : > { %v918_v22 = vadd.f32 %v894_v21, %v805_v20 }
 0x4dd   : > { %934 = vst [vmem:[#allocation2 + $0x38] sm:$0xff] %v918_v22 }
 0x4e2   : > { %v897_v24 = vpop.f32.mrf.mxu3 }
 0x4e3   : > { %v919_v25 = vadd.f32 %v897_v24, %v806_v23 }
 0x4e5   : > { %935 = vst [vmem:[#allocation2 + $0x60] sm:$0xff] %v919_v25 }
 0x4ea   : > { %v899_v28 = vpop.f32.mrf.mxu3 }
 0x4eb   : > { %v920_v1 = vadd.f32 %v899_v28, %v807_v55 }
 0x4ed   : > { %936 = vst [vmem:[#allocation2 + $0x70] sm:$0xff] %v920_v1 }
 0x4f2   : > { %v902_v30 = vpop.f32.mrf.mxu3 }
 0x4f3   : > { %v921_v6 = vadd.f32 %v902_v30, %v808_v29 }
 0x4f5   : > { %937 = vst [vmem:[#allocation2 + $0x78] sm:$0xff] %v921_v6 }
 0x4fa   : > { %v904_v7 = vpop.f32.mrf.mxu3 }
 0x4fb   : > { %v922_v32 = vadd.f32 %v904_v7, %v809_v31 }
 0x4fd   : > { %938 = vst [vmem:[#allocation2 + $0x28] sm:$0xff] %v922_v32 }
 0x4fe PF: > { %s2038_s9 = sld [smem:[#allocation21_spill]]  ;;  %p1242_p3 = scmp.ge.s32.totalorder %s1625_s28, 2 }
 0x500   : > { %p1232_p7 = pnand %p1242_p3, %p1726_p6 }
 0x502   : > { %p1233_p9 = pneg %p1232_p7 }
 0x504   : > { %s981_s26 = sand.u32 1, %s2038_s9  }
 0x505   : > { %s982_s10 = scalar_lea.sflag [#allocation6], %s981_s26 }
 0x506   : > { %1592 = dma.done.wait (%p1233_p9), %s982_s10, 256  }
 0x507   : > { %1594 = vsyncadd (%p1233_p9), %s982_s10, 4294967040  ;;  %s27_s28 = sadd.s32 1, %s1625_s28   ;;  %s2040_s6 = sld [smem:[#allocation27_spill]] }
 0x508   : > { %p24_p2 = scmp.ge.s32.totalorder %s27_s28, 10   ;;  %s2041_s24 = sld [smem:[#allocation22_spill]] }
 0x509   : > { %s2042_s25 = sld [smem:[#allocation23_spill]]  ;;  %s2045_s21 = smov %s1601_s22 }
 0x50a   : > { %s2043_s26 = sld [smem:[#allocation25_spill]]  ;;  %s2046_s22 = smov %s1605_s23 }
 0x50b   : > { %s2044_s27 = sld [smem:[#allocation26_spill]]  ;;  %26 = sbr.rel (!%p24_p2) target bundleno = 16 (0x10), region = 140 }
 0x50d   : > { %s2047_s23 = smov %s2040_s6 }
 0x510   :  { %988 = vsyncpa [#allocation5], 1 }
 0x511   :  { %990 = vsyncpa [#allocation5 + $0x1], 1 }
 0x512   :  { %991 = vsyncpa [#allocation10], 1 }
 0x513   :  { %993 = vsyncpa [#allocation10 + $0x1], 1 }
 0x514   :  { %994 = vsyncpa [#allocation13], 1 }
 0x515   :  { %995 = vsyncpa [#allocation6], 1 }
 0x516   :  { %997 = vsyncpa [#allocation6 + $0x1], 1 }
 0x517   :  { %998 = vsyncpa [#allocation7], 1 }
 0x518   :  { %1000 = vsyncpa [#allocation7 + $0x1], 1 }

</bundles_post_ra>
